<compile_context>
chip_gen: v5e
topology: v5e:2x2
jax: 0.10.0
libtpu: 0.0.40
codegen_flags: <defaults>
</compile_context>

<pallas_src>
import jax
import jax.numpy as jnp
import numpy as np
from jax.experimental import pallas as pl
from jax.experimental.pallas import tpu as pltpu

_VMEM_LIMIT = 32 * 1024 * 1024          # explicit scoped-VMEM budget (v5e default is 16 MiB)
_COMPUTE_DTYPE = jnp.bfloat16           # streamed MXU operand dtype (f32 accumulation)


def _round_up(x, m):
    return ((x + m - 1) // m) * m


def _choose_n_tile(n, max_tile=1024):
    """Lane-dense (multiple-of-128) tile of the class dim.

    Grid uses pl.cdiv and Pallas masks the ragged last block, so the tile does
    not need to divide N (production N=2000 -> two 1024-wide pipelined tiles).
    """
    return min(max_tile, _round_up(n, 128))


# ---------------------------------------------------------------------------
# Kernel 1: spatial + temporal pooling as one weighted reduction over L=T*H*W
#   x3: (B, C, L)   pure reshape of NCDHW, no transpose / HBM shuffle
#   pw: (1, 1, L)   precomputed pooling weights
#   out: visual (B, C) f32
# ---------------------------------------------------------------------------
def _pool_kernel(x_ref, pw_ref, vis_ref):
    # f32 accumulation regardless of input dtype.
    # TODO(synk): for bf16 inputs at large B*C*L, strip-mine over C chunks
    # instead of up-casting the whole block.
    x = x_ref[...].astype(jnp.float32)            # (B, C, L)
    w = pw_ref[...].astype(jnp.float32)           # (1, 1, L)
    vis_ref[...] = jnp.sum(x * w, axis=-1)        # (B, C)


def spatiotemporal_pool(x3, pool_w):
    B, C, L = x3.shape
    return pl.pallas_call(
        _pool_kernel,
        out_shape=jax.ShapeDtypeStruct((B, C), jnp.float32),
        grid=(1,),
        in_specs=[pl.BlockSpec((B, C, L), lambda i: (0, 0, 0)),
                  pl.BlockSpec((1, 1, L), lambda i: (0, 0, 0))],
        out_specs=pl.BlockSpec((B, C), lambda i: (0, 0)),
        compiler_params=pltpu.CompilerParams(
            dimension_semantics=("arbitrary",),
            vmem_limit_bytes=_VMEM_LIMIT),
    )(x3, pool_w)


# ---------------------------------------------------------------------------
# Kernel 2: word_emb_mapper + broadcast-add(visual)    (tiny, single block)
#   emb_g:   (BK, D)  gathered word-embedding rows (bf16)
#   w_map:   (D, C)   (bf16), b_map: (1, C) f32
#   vis_rep: (BK, C)  visual feature repeated topk times (f32)
#   out:     fused (BK, C) f32
# ---------------------------------------------------------------------------
def _map_fuse_kernel(emb_ref, wm_ref, bm_ref, visrep_ref, fused_ref):
    mapped = jnp.dot(emb_ref[...], wm_ref[...],
                     preferred_element_type=jnp.float32)          # (BK, C)
    fused_ref[...] = mapped + bm_ref[...] + visrep_ref[...]


def map_and_fuse(emb_g, w_map, b_map, vis_rep):
    BK, D = emb_g.shape
    C = w_map.shape[1]
    return pl.pallas_call(
        _map_fuse_kernel,
        out_shape=jax.ShapeDtypeStruct((BK, C), jnp.float32),
        grid=(1,),
        in_specs=[pl.BlockSpec((BK, D), lambda i: (0, 0)),
                  pl.BlockSpec((D, C), lambda i: (0, 0)),
                  pl.BlockSpec((1, C), lambda i: (0, 0)),
                  pl.BlockSpec((BK, C), lambda i: (0, 0))],
        out_specs=pl.BlockSpec((BK, C), lambda i: (0, 0)),
        compiler_params=pltpu.CompilerParams(
            dimension_semantics=("arbitrary",),
            vmem_limit_bytes=_VMEM_LIMIT),
    )(emb_g, w_map, b_map.reshape(1, C), vis_rep)


# ---------------------------------------------------------------------------
# Kernel 3: weight-streaming Linear, N tiled in lane-dense blocks.
#   No cross-step scratch -> grid axis is "parallel" (v7x: both TensorCores
#   share the weight DMA stream).  x stays resident; one (K, TN) weight tile
#   streams per step.
# ---------------------------------------------------------------------------
def _linear_kernel(x_ref, w_ref, b_ref, o_ref):
    o_ref[...] = (jnp.dot(x_ref[...], w_ref[...],
                          preferred_element_type=jnp.float32)
                  + b_ref[...]).astype(o_ref.dtype)


def linear(x, w, b):
    M, K = x.shape
    N = w.shape[1]
    TN = _choose_n_tile(N)
    x = x.astype(w.dtype)          # activation rows match the streamed weight dtype
    return pl.pallas_call(
        _linear_kernel,
        out_shape=jax.ShapeDtypeStruct((M, N), jnp.float32),
        grid=(pl.cdiv(N, TN),),
        in_specs=[pl.BlockSpec((M, K), lambda n: (0, 0)),
                  pl.BlockSpec((K, TN), lambda n: (0, n)),
                  pl.BlockSpec((1, TN), lambda n: (0, n))],
        out_specs=pl.BlockSpec((M, TN), lambda n: (0, n)),
        compiler_params=pltpu.CompilerParams(
            dimension_semantics=("parallel",),
            vmem_limit_bytes=_VMEM_LIMIT),
    )(x, w, b.reshape(1, N))


# ---------------------------------------------------------------------------
# Param preparation: make bf16 copies of the streamed weight matrices ONCE.
# ---------------------------------------------------------------------------
def prepare_params(params, compute_dtype=_COMPUTE_DTYPE):
    p = dict(params)
    for k in ("w_gloss", "w_map", "w_fused"):
        p[k] = params[k].astype(compute_dtype)
    return p


# ---------------------------------------------------------------------------
# SepConvHead forward (eval mode)
# ---------------------------------------------------------------------------
def sep_conv_head_forward(x, params, topk=5):
    w_gloss, b_gloss = params["w_gloss"], params["b_gloss"]

    if x.ndim > 3:
        B, C, T, H, W = x.shape
        assert T >= 2, "avg_pool3d with temporal kernel 2 requires T >= 2"
        L = T * H * W
        x3 = x.reshape(B, C, L)   # contiguous view of NCDHW, no transpose
        # Closed-form of avg_pool3d(k=(2,H,W), stride=1) -> view -> permute ->
        # mean(dim=1): temporal weights [1,2,...,2,1]/(2(T-1)), spatial 1/(H*W).
        # (The module passes stride=1 explicitly, so windows overlap.)
        tw = jnp.full((T,), 2.0, jnp.float32).at[0].set(1.0).at[-1].set(1.0)
        pw = (jnp.repeat(tw, H * W) / (2.0 * (T - 1) * H * W)).reshape(1, 1, L)
        visual = spatiotemporal_pool(x3, pw)                    # (B, C) f32
    elif x.ndim == 3:
        visual = jnp.mean(x.astype(jnp.float32), axis=1)        # (B, C)
    else:
        visual = x.astype(jnp.float32)                          # (B, C)

    logits = linear(visual, w_gloss, b_gloss)                   # (B, N) f32
    B, C = visual.shape

    # eval-mode top-k (== argsort descending, first topk).
    # TODO(synk): training branch masks the label column with -inf first.
    _, topk_idx = jax.lax.top_k(logits, topk)                   # (B, topk)
    topk_idx_flat = topk_idx.reshape(-1)                        # (B*topk,)

    # gather-before-map: only map the B*topk selected embedding rows
    # (identical to mapping the whole vocabulary and gathering, Linear is linear).
    emb_g = jnp.take(params["word_embedding"], topk_idx_flat, axis=0)  # (BK, D)
    emb_g = emb_g.astype(params["w_map"].dtype)
    vis_rep = jnp.repeat(visual, topk, axis=0)                  # (BK, C) f32, ~KB

    fused = map_and_fuse(emb_g, params["w_map"], params["b_map"], vis_rep)  # (BK, C)
    wf = linear(fused, params["w_fused"], params["b_fused"])    # (BK, N)
    wf_logits = wf.reshape(B, topk, -1)

    return {"gloss_logits": logits,
            "word_fused_gloss_logits": wf_logits,
            "topk_idx": topk_idx_flat}


if __name__ == "__main__":
    # Small, TPU-friendly stand-ins for (input_size=1024, classes=2000, emb=300):
    B, C, T, H, W = 2, 128, 8, 4, 4      # input video features (NCDHW)
    N_CLASSES = 128                      # stands in for 2000 glosses
    V = N_CLASSES                        # word-embedding rows (one per gloss)
    D_EMB = 64                           # stands in for word_emb_dim=300
    TOPK = 5

    key = jax.random.PRNGKey(0)
    ks = jax.random.split(key, 8)
    params_f32 = {
        "word_embedding": jax.random.normal(ks[0], (V, D_EMB), jnp.float32),
        # Linear weights stored as (in, out) == PyTorch weight.T
        "w_gloss": 0.02 * jax.random.normal(ks[1], (C, N_CLASSES), jnp.float32),
        "b_gloss": 0.02 * jax.random.normal(ks[2], (N_CLASSES,), jnp.float32),
        "w_map":   0.02 * jax.random.normal(ks[3], (D_EMB, C), jnp.float32),
        "b_map":   0.02 * jax.random.normal(ks[4], (C,), jnp.float32),
        "w_fused": 0.02 * jax.random.normal(ks[5], (C, N_CLASSES), jnp.float32),
        "b_fused": 0.02 * jax.random.normal(ks[6], (N_CLASSES,), jnp.float32),
    }
    x = jax.random.normal(ks[7], (B, C, T, H, W), jnp.float32)

    params = prepare_params(params_f32)           # bf16 weight copies, made once
    out = sep_conv_head_forward(x, params, topk=TOPK)
    jax.block_until_ready(out)

    assert out["gloss_logits"].shape == (B, N_CLASSES)
    assert out["word_fused_gloss_logits"].shape == (B, TOPK, N_CLASSES)
    assert out["topk_idx"].shape == (B * TOPK,)

    # --- pure-JAX reference (same bf16 operand rounding + f32 accumulation;
    #     reuses the kernel's topk_idx to avoid tie-break divergence) ---
    hp = jax.lax.Precision.HIGHEST
    cd = _COMPUTE_DTYPE

    def ref_dot(a, w):
        return jnp.dot(a.astype(cd), w.astype(cd), precision=hp,
                       preferred_element_type=jnp.float32)

    m = x.mean(axis=(3, 4))                                   # (B, C, T)
    y = 0.5 * (m[:, :, :-1] + m[:, :, 1:])                    # avg_pool3d k=(2,H,W), stride=1
    vis_ref = y.mean(axis=-1)                                 # (B, C)
    logits_ref = ref_dot(vis_ref, params_f32["w_gloss"]) + params_f32["b_gloss"]
    emb_ref = params_f32["word_embedding"][out["topk_idx"]]
    mapped_ref = ref_dot(emb_ref, params_f32["w_map"]) + params_f32["b_map"]
    fused_ref = jnp.repeat(vis_ref, TOPK, axis=0) + mapped_ref
    wf_ref = (ref_dot(fused_ref, params_f32["w_fused"])
              + params_f32["b_fused"]).reshape(B, TOPK, N_CLASSES)

    np.testing.assert_allclose(np.asarray(out["gloss_logits"]),
                               np.asarray(logits_ref), rtol=2e-2, atol=2e-3)
    np.testing.assert_allclose(np.asarray(out["word_fused_gloss_logits"]),
                               np.asarray(wf_ref), rtol=2e-2, atol=2e-3)

    print("KERNEL_OK")
</pallas_src>

<mosaic_0001>
module attributes {stable_mosaic.version = 11 : i64} {
  func.func @_pool_kernel(%arg0: i32, %arg1: memref<2x128x128xf32, #tpu.memory_space<vmem>>, %arg2: memref<1x1x128xf32, #tpu.memory_space<vmem>>, %arg3: memref<2x128xf32, #tpu.memory_space<vmem>>) attributes {dimension_semantics = [#tpu.dimension_semantics<arbitrary>], iteration_bounds = array<i64: 1>, scalar_prefetch = 0 : i64, scratch_operands = 0 : i64, tpu.core_type = #tpu.core_type<tc>, window_params = [{pipeline_mode = #tpu.pipeline_mode<synchronous>, transform_indices = @transform_0, window_bounds = array<i64: 2, 128, 128>}, {pipeline_mode = #tpu.pipeline_mode<synchronous>, transform_indices = @transform_1, window_bounds = array<i64: 1, 1, 128>}, {pipeline_mode = #tpu.pipeline_mode<synchronous>, transform_indices = @transform_2, window_bounds = array<i64: 2, 128>}]} {
    %c0 = arith.constant 0 : index
    %c0_0 = arith.constant 0 : index
    %c0_1 = arith.constant 0 : index
    %0 = vector.load %arg1[%c0, %c0_0, %c0_1] : memref<2x128x128xf32, #tpu.memory_space<vmem>>, vector<2x128x128xf32>
    %c0_2 = arith.constant 0 : index
    %c0_3 = arith.constant 0 : index
    %c0_4 = arith.constant 0 : index
    %1 = vector.load %arg2[%c0_2, %c0_3, %c0_4] : memref<1x1x128xf32, #tpu.memory_space<vmem>>, vector<1x1x128xf32>
    %2 = vector.broadcast %1 : vector<1x1x128xf32> to vector<2x128x128xf32>
    %3 = arith.mulf %0, %2 : vector<2x128x128xf32>
    %cst = arith.constant dense<0.000000e+00> : vector<2x128xf32>
    %4 = vector.multi_reduction <add>, %3, %cst [2] : vector<2x128x128xf32> to vector<2x128xf32>
    %c0_5 = arith.constant 0 : index
    %c0_6 = arith.constant 0 : index
    %5 = vector.load %arg3[%c0_5, %c0_6] : memref<2x128xf32, #tpu.memory_space<vmem>>, vector<2x128xf32>
    tpu.vector_store %arg3[%c0_5, %c0_6], %4 {strides = array<i32>} : memref<2x128xf32, #tpu.memory_space<vmem>>, vector<2x128xf32>,
    return
  }
  func.func @transform_0(%arg0: i32) -> (i32, i32, i32) {
    %c0_i32 = arith.constant 0 : i32
    %c0_i32_0 = arith.constant 0 : i32
    %c0_i32_1 = arith.constant 0 : i32
    %c0_i32_2 = arith.constant 0 : i32
    return %c0_i32, %c0_i32_0, %c0_i32_1 : i32, i32, i32
  }
  func.func @transform_1(%arg0: i32) -> (i32, i32, i32) {
    %c0_i32 = arith.constant 0 : i32
    %c0_i32_0 = arith.constant 0 : i32
    %c0_i32_1 = arith.constant 0 : i32
    %c0_i32_2 = arith.constant 0 : i32
    return %c0_i32, %c0_i32_0, %c0_i32_1 : i32, i32, i32
  }
  func.func @transform_2(%arg0: i32) -> (i32, i32) {
    %c0_i32 = arith.constant 0 : i32
    %c0_i32_0 = arith.constant 0 : i32
    %c0_i32_1 = arith.constant 0 : i32
    return %c0_i32, %c0_i32_0 : i32, i32
  }
}

</mosaic_0001>

<bundles_post_ra>
// kernel: tpu_custom_call.1
= control target key start
LH: loop header
LB: loop body
LE: loop exit
PB: predicated region body
PF: predicated region fallthrough
CT: control target
= control target key end

     0   :  { %7 = vsyncpa [#allocation3], 0  ;;  %s525_s0 = inlined_call_operand.hbm [shape: f32[2,128,128], index: 0, kind: input, shape index: {}]   ;;  %s526_s1 = inlined_call_operand.hbm [shape: f32[1,1,128], index: 1, kind: input, shape index: {}]   ;;  %s527_s2 = inlined_call_operand.hbm [shape: f32[2,128], index: 2, kind: output, shape index: {}]  }
   0x1   :  { %8 = vsyncpa [#allocation6], 0 }
   0x2   :  { %9 = vsyncpa [#allocation4], 0  ;;  %s14_s11 = sshll.u32 %s525_s0, 4  ;;  %s406_s12 = smov [#allocation2]   ;;  %s15_s11 = int_to_ptr.hbm [resolvable:$true] %s14_s11 }
   0x3   :  { %s16_s13 = sshll.u32 %s406_s12, 4  ;;  %s28_s16 = sshll.u32 %s526_s1, 4  ;;  %s17_s13 = int_to_ptr.vmem [resolvable:$true] %s16_s13  ;;  %s29_s16 = int_to_ptr.hbm [resolvable:$true] %s28_s16 }
   0x4   :  { %s407_s17 = smov 128   ;;  %s408_s18 = smov 8  }
   0x5   :  { %22 = dma.hbm_to_vmem [thread:$0]  %s15_s11, 4096, %s17_s13, [#allocation3], %s407_s17, %s407_s17, %s408_s18  }
   0x6   :  { %s409_s19 = smov [#allocation5]  }
   0x7   :  { %s30_s20 = sshll.u32 %s409_s19, 4  ;;  %s31_s20 = int_to_ptr.vmem [resolvable:$true] %s30_s20 }
   0x8   :  { %33 = dma.hbm_to_vmem [thread:$0]  %s29_s16, 16, %s31_s20, [#allocation6]  }
   0x9   :  { %400 = dma.done.wait [#allocation3], 4096  }
   0xa   :  { %401 = vsyncadd [#allocation3], 4294963200 }
   0xb   :  { %402 = dma.done.wait [#allocation6], 16  }
   0xc   :  { %403 = vsyncadd [#allocation6], 4294967280  ;;  %v46_v0 = vld [vmem:[#allocation2 + $0x20] sm:$0xff]  ;;  %v44_v2 = vld [vmem:[#allocation2 + $0x10] sm:$0xff]  ;;  %vm211_vm0 = vcmask 130112   ;;  %vm215_vm1 = vcmask 195712  }
   0xd   :  { %v432_v1 = vld [vmem:[#allocation5] ss:$0 sm:$0xff]  ;;  %v47_v7 = vld [vmem:[#allocation2 + $0x28] sm:$0xff]  ;;  %v45_v8 = vld [vmem:[#allocation2 + $0x18] sm:$0xff]  ;;  %vm219_vm2 = vcmask 261312   ;;  %vm223_vm3 = vcmask 326912  }
   0xe   :  { %v42_v3 = vld [vmem:[#allocation2] sm:$0xff]  ;;  %v82_v4 = vmul.f32 %v432_v1, %v46_v0  ;;  %v80_v5 = vmul.f32 %v432_v1, %v44_v2  ;;  %v43_v9 = vld [vmem:[#allocation2 + $0x8] sm:$0xff]  ;;  %v83_v10 = vmul.f32 %v432_v1, %v47_v7  ;;  %v81_v11 = vmul.f32 %v432_v1, %v45_v8  ;;  %v49_v14 = vld [vmem:[#allocation2 + $0x38] sm:$0xff]  ;;  %s410_s0 = smov [#allocation7]   ;;  %s311_s23 = sshll.u32 %s527_s2, 4  ;;  %s312_s23 = int_to_ptr.hbm [resolvable:$true] %s311_s23 }
   0xf   :  { %v78_v6 = vmul.f32 %v432_v1, %v42_v3  ;;  %v79_v12 = vmul.f32 %v432_v1, %v43_v9  ;;  %v50_v13 = vld [vmem:[#allocation2 + $0x40] sm:$0xff]  ;;  %v48_v15 = vld [vmem:[#allocation2 + $0x30] sm:$0xff]  ;;  %v85_v17 = vmul.f32 %v432_v1, %v49_v14  ;;  %v53_v19 = vld [vmem:[#allocation2 + $0x58] sm:$0xff]  ;;  %v206_v2 = vlaneseq  ;;  %s309_s1 = sshll.u32 %s410_s0, 4  ;;  %s310_s1 = int_to_ptr.vmem [resolvable:$true] %s309_s1 }
  0x10   :  { %118 = vadd.xlane.f32.xlu2 %v82_v4  ;;  %114 = vadd.xlane.f32.xlu1 %v80_v5  ;;  %v86_v16 = vmul.f32 %v432_v1, %v50_v13  ;;  %v84_v18 = vmul.f32 %v432_v1, %v48_v15  ;;  %v52_v20 = vld [vmem:[#allocation2 + $0x50] sm:$0xff]  ;;  %v51_v21 = vld [vmem:[#allocation2 + $0x48] sm:$0xff]  ;;  %v89_v22 = vmul.f32 %v432_v1, %v53_v19  ;;  %v58_v26 = vld [vmem:[#allocation2 + $0x80] sm:$0xff]  ;;  %vm227_vm4 = vcmask 392512  }
  0x11   :  { %110 = vadd.xlane.f32.xlu0 %v78_v6  ;;  %v88_v23 = vmul.f32 %v432_v1, %v52_v20  ;;  %v87_v24 = vmul.f32 %v432_v1, %v51_v21  ;;  %v59_v25 = vld [vmem:[#allocation2 + $0x88] sm:$0xff]  ;;  %v54_v27 = vld [vmem:[#allocation2 + $0x60] sm:$0xff]  ;;  %v94_v29 = vmul.f32 %v432_v1, %v58_v26  ;;  %v61_v32 = vld [vmem:[#allocation2 + $0x98] sm:$0xff]  ;;  %v466_v6 = vand.u32 127, %v206_v2 }
  0x12   :  { %v95_v28 = vmul.f32 %v432_v1, %v59_v25  ;;  %v90_v30 = vmul.f32 %v432_v1, %v54_v27  ;;  %v62_v31 = vld [vmem:[#allocation2 + $0xa0] sm:$0xff]  ;;  %v60_v33 = vld [vmem:[#allocation2 + $0x90] sm:$0xff]  ;;  %v97_v35 = vmul.f32 %v432_v1, %v61_v32  ;;  %v65_v37 = vld [vmem:[#allocation2 + $0xb8] sm:$0xff]  ;;  %vm231_vm5 = vcmask 458112  }
  0x13   :  { %v98_v34 = vmul.f32 %v432_v1, %v62_v31  ;;  %v96_v36 = vmul.f32 %v432_v1, %v60_v33  ;;  %v64_v38 = vld [vmem:[#allocation2 + $0xb0] sm:$0xff]  ;;  %v63_v39 = vld [vmem:[#allocation2 + $0xa8] sm:$0xff]  ;;  %v101_v40 = vmul.f32 %v432_v1, %v65_v37  ;;  %v66_v45 = vld [vmem:[#allocation2 + $0xc0] sm:$0xff]  ;;  %v209_v7 = vadd.s32 4294967288, %v466_v6 }
  0x14   :  { %v100_v41 = vmul.f32 %v432_v1, %v64_v38  ;;  %v99_v42 = vmul.f32 %v432_v1, %v63_v39  ;;  %v68_v43 = vld [vmem:[#allocation2 + $0xd0] sm:$0xff]  ;;  %v67_v44 = vld [vmem:[#allocation2 + $0xc8] sm:$0xff]  ;;  %v102_v48 = vmul.f32 %v432_v1, %v66_v45  ;;  %v70_v50 = vld [vmem:[#allocation2 + $0xe0] sm:$0xff]  ;;  %v213_v8 = vadd.s32 4294967280, %v466_v6 }
  0x15   :  { %v104_v46 = vmul.f32 %v432_v1, %v68_v43  ;;  %v103_v47 = vmul.f32 %v432_v1, %v67_v44  ;;  %v55_v49 = vld [vmem:[#allocation2 + $0x68] sm:$0xff]  ;;  %v69_v51 = vld [vmem:[#allocation2 + $0xd8] sm:$0xff]  ;;  %v106_v53 = vmul.f32 %v432_v1, %v70_v50  ;;  %v56_v55 = vld [vmem:[#allocation2 + $0x70] sm:$0xff]  ;;  %v221_v37 = vadd.s32 4294967264, %v466_v6 }
  0x16   :  { %v91_v52 = vmul.f32 %v432_v1, %v55_v49  ;;  %v105_v54 = vmul.f32 %v432_v1, %v69_v51  ;;  %v72_v56 = vld [vmem:[#allocation2 + $0xf0] sm:$0xff]  ;;  %v71_v57 = vld [vmem:[#allocation2 + $0xe8] sm:$0xff]  ;;  %v92_v58 = vmul.f32 %v432_v1, %v56_v55  ;;  %v73_v61 = vld [vmem:[#allocation2 + $0xf8] sm:$0xff]  ;;  %v225_v39 = vadd.s32 4294967256, %v466_v6 }
  0x17   :  { %v108_v59 = vmul.f32 %v432_v1, %v72_v56  ;;  %v107_v60 = vmul.f32 %v432_v1, %v71_v57  ;;  %v57_v62 = vld [vmem:[#allocation2 + $0x78] sm:$0xff]  ;;  %v109_v63 = vmul.f32 %v432_v1, %v73_v61  ;;  %v237_v55 = vadd.s32 4294967232, %v466_v6 }
  0x18   :  { %120 = vadd.xlane.f32.xlu2 %v83_v10  ;;  %116 = vadd.xlane.f32.xlu1 %v81_v11  ;;  %v93_v0 = vmul.f32 %v432_v1, %v57_v62  ;;  %v241_v62 = vadd.s32 4294967224, %v466_v6  ;;  %vm235_vm6 = vcmask 523712   ;;  %vm239_vm7 = vcmask 589312  }
  0x19   :  { %112 = vadd.xlane.f32.xlu0 %v79_v12  ;;  %vm243_vm8 = vcmask 654912   ;;  %vm247_vm9 = vcmask 720512   ;;  %vm251_vm10 = vcmask 786112   ;;  %vm255_vm11 = vcmask 851712  }
  0x1a   :  { %vm259_vm12 = vcmask 917312   ;;  %vm263_vm13 = vcmask 982912   ;;  %vm267_vm14 = vcmask 1048512   ;;  %vm300_vm15 = vcmask 1041409  }
  0x20   :  { %126 = vadd.xlane.f32.xlu2 %v86_v16  ;;  %124 = vadd.xlane.f32.xlu1 %v85_v17 }
  0x21   :  { %122 = vadd.xlane.f32.xlu0 %v84_v18 }
  0x28   :  { %132 = vadd.xlane.f32.xlu2 %v89_v22  ;;  %130 = vadd.xlane.f32.xlu1 %v88_v23 }
  0x29   :  { %128 = vadd.xlane.f32.xlu0 %v87_v24 }
  0x30   :  { %144 = vadd.xlane.f32.xlu2 %v95_v28  ;;  %142 = vadd.xlane.f32.xlu1 %v94_v29 }
  0x31   :  { %134 = vadd.xlane.f32.xlu0 %v90_v30 }
  0x38   :  { %150 = vadd.xlane.f32.xlu2 %v98_v34  ;;  %148 = vadd.xlane.f32.xlu1 %v97_v35  ;;  %v217_v34 = vadd.s32 4294967272, %v466_v6 }
  0x39   :  { %146 = vadd.xlane.f32.xlu0 %v96_v36 }
  0x40   :  { %156 = vadd.xlane.f32.xlu2 %v101_v40  ;;  %154 = vadd.xlane.f32.xlu1 %v100_v41 }
  0x41   :  { %152 = vadd.xlane.f32.xlu0 %v99_v42 }
  0x48   :  { %162 = vadd.xlane.f32.xlu2 %v104_v46  ;;  %160 = vadd.xlane.f32.xlu1 %v103_v47  ;;  %v229_v47 = vadd.s32 4294967248, %v466_v6 }
  0x49   :  { %158 = vadd.xlane.f32.xlu0 %v102_v48 }
  0x50   :  { %136 = vadd.xlane.f32.xlu2 %v91_v52  ;;  %166 = vadd.xlane.f32.xlu1 %v106_v53  ;;  %v233_v52 = vadd.s32 4294967240, %v466_v6 }
  0x51   :  { %164 = vadd.xlane.f32.xlu0 %v105_v54 }
  0x58   :  { %138 = vadd.xlane.f32.xlu1 %v92_v58  ;;  %170 = vadd.xlane.f32.xlu2 %v108_v59 }
  0x59   :  { %168 = vadd.xlane.f32.xlu0 %v107_v60 }
  0x60   :  { %172 = vadd.xlane.f32.xlu1 %v109_v63 }
  0x61   :  { %140 = vadd.xlane.f32.xlu0 %v93_v0 }
  0x83   :  { %v119_v3 = vpop.xlane.xlu2 %118  ;;  %v115_v4 = vpop.xlane.xlu1 %114 }
  0x84   :  { %v111_v5 = vpop.xlane.xlu0 %110  ;;  %v214_v13 = vperm.slane %v115_v4, %v213_v8  ;;  %v222_v51 = vperm.slane %v119_v3, %v221_v37 }
  0x85   :  { %v208_v12 = vperm.slane %v111_v5, %v466_v6 }
  0x8b   :  { %v470_v9 = vpop.xlane.xlu2 %120  ;;  %v117_v10 = vpop.xlane.xlu1 %116 }
  0x8c   :  { %v113_v11 = vpop.xlane.xlu0 %112  ;;  %v218_v46 = vperm.slane %v117_v10, %v217_v34  ;;  %v226_v54 = vperm.slane %v470_v9, %v225_v39 }
  0x8d   :  { %v210_v1 = vperm.slane %v113_v11, %v209_v7  ;;  %v249_v11 = vadd.s32 4294967208, %v466_v6 }
  0x8f   :  { %v212_v14 = vsel %vm211_vm0, %v210_v1, %v208_v12 }
  0x90   :  { %v216_v15 = vsel %vm215_vm1, %v214_v13, %v212_v14 }
  0x91   :  { %v220_v48 = vsel %vm219_vm2, %v218_v46, %v216_v15 }
  0x92   :  { %v224_v56 = vsel %vm223_vm3, %v222_v51, %v220_v48 }
  0x93   :  { %v475_v16 = vpop.xlane.xlu2 %126  ;;  %v477_v17 = vpop.xlane.xlu1 %124  ;;  %v228_v3 = vsel %vm227_vm4, %v226_v54, %v224_v56 }
  0x94   :  { %v123_v18 = vpop.xlane.xlu0 %122  ;;  %v234_v2 = vperm.slane %v477_v17, %v233_v52  ;;  %v238_v10 = vperm.slane %v475_v16, %v237_v55  ;;  %v253_v17 = vadd.s32 4294967200, %v466_v6  ;;  %v257_v16 = vadd.s32 4294967192, %v466_v6 }
  0x95   :  { %v230_v57 = vperm.slane %v123_v18, %v229_v47 }
  0x97   :  { %v232_v4 = vsel %vm231_vm5, %v230_v57, %v228_v3 }
  0x98   :  { %v236_v12 = vsel %vm235_vm6, %v234_v2, %v232_v4 }
  0x9b   :  { %v479_v19 = vpop.xlane.xlu2 %132  ;;  %v481_v20 = vpop.xlane.xlu1 %130 }
  0x9c   :  { %v483_v21 = vpop.xlane.xlu0 %128 }
  0x9d   :  { %v242_v1 = vperm.slane %v483_v21, %v241_v62  ;;  %v261_v21 = vadd.s32 4294967184, %v466_v6 }
  0xa3   :  { %v145_v22 = vpop.xlane.xlu2 %144  ;;  %v143_v23 = vpop.xlane.xlu1 %142 }
  0xa4   :  { %v485_v24 = vpop.xlane.xlu0 %134  ;;  %v270_v30 = vperm.slane %v145_v22, %v209_v7  ;;  %v269_v31 = vperm.slane %v143_v23, %v466_v6  ;;  %v240_v23 = vsel %vm239_vm7, %v238_v10, %v236_v12 }
  0xa6   :  { %v271_v35 = vsel %vm211_vm0, %v270_v30, %v269_v31 }
  0xab   :  { %v151_v25 = vpop.xlane.xlu2 %150  ;;  %v149_v26 = vpop.xlane.xlu1 %148 }
  0xac   :  { %v147_v27 = vpop.xlane.xlu0 %146  ;;  %v274_v36 = vperm.slane %v149_v26, %v217_v34  ;;  %v276_v40 = vperm.slane %v151_v25, %v221_v37  ;;  %v244_v26 = vsel %vm243_vm8, %v242_v1, %v240_v23  ;;  %v265_v34 = vadd.s32 4294967176, %v466_v6 }
  0xad   :  { %v272_v33 = vperm.slane %v147_v27, %v213_v8  ;;  %v245_v8 = vadd.s32 4294967216, %v466_v6 }
  0xaf   :  { %v273_v38 = vsel %vm215_vm1, %v272_v33, %v271_v35  ;;  %v246_v22 = vperm.slane %v481_v20, %v245_v8  ;;  %v254_v33 = vperm.slane %v485_v24, %v253_v17 }
  0xb0   :  { %v275_v43 = vsel %vm219_vm2, %v274_v36, %v273_v38 }
  0xb1   :  { %v277_v50 = vsel %vm223_vm3, %v276_v40, %v275_v43  ;;  %v248_v20 = vsel %vm247_vm9, %v246_v22, %v244_v26 }
  0xb3   :  { %v157_v28 = vpop.xlane.xlu2 %156  ;;  %v155_v29 = vpop.xlane.xlu1 %154 }
  0xb4   :  { %v153_v32 = vpop.xlane.xlu0 %152  ;;  %v280_v49 = vperm.slane %v155_v29, %v229_v47  ;;  %v282_v58 = vperm.slane %v157_v28, %v233_v52 }
  0xb5   :  { %v278_v44 = vperm.slane %v153_v32, %v225_v39  ;;  %v250_v32 = vperm.slane %v479_v19, %v249_v11 }
  0xb7   :  { %v279_v53 = vsel %vm227_vm4, %v278_v44, %v277_v50  ;;  %v252_v40 = vsel %vm251_vm10, %v250_v32, %v248_v20 }
  0xb8   :  { %v281_v59 = vsel %vm231_vm5, %v280_v49, %v279_v53  ;;  %v256_v19 = vsel %vm255_vm11, %v254_v33, %v252_v40 }
  0xb9   :  { %v283_v7 = vsel %vm235_vm6, %v282_v58, %v281_v59 }
  0xbb   :  { %v163_v41 = vpop.xlane.xlu2 %162  ;;  %v161_v42 = vpop.xlane.xlu1 %160 }
  0xbc   :  { %v159_v45 = vpop.xlane.xlu0 %158  ;;  %v286_v5 = vperm.slane %v161_v42, %v241_v62  ;;  %v288_v13 = vperm.slane %v163_v41, %v245_v8 }
  0xbd   :  { %v284_v60 = vperm.slane %v159_v45, %v237_v55 }
  0xbf   :  { %v285_v9 = vsel %vm239_vm7, %v284_v60, %v283_v7 }
  0xc0   :  { %v287_v14 = vsel %vm243_vm8, %v286_v5, %v285_v9 }
  0xc1   :  { %v289_v28 = vsel %vm247_vm9, %v288_v13, %v287_v14 }
  0xc3   :  { %v167_v61 = vpop.xlane.xlu1 %166  ;;  %v137_v63 = vpop.xlane.xlu2 %136 }
  0xc4   :  { %v165_v0 = vpop.xlane.xlu0 %164  ;;  %v292_v27 = vperm.slane %v167_v61, %v253_v17  ;;  %v258_v35 = vperm.slane %v137_v63, %v257_v16 }
  0xc5   :  { %v290_v15 = vperm.slane %v165_v0, %v249_v11 }
  0xc6   :  { %v260_v6 = vsel %vm259_vm12, %v258_v35, %v256_v19 }
  0xc7   :  { %v291_v29 = vsel %vm251_vm10, %v290_v15, %v289_v28 }
  0xc8   :  { %v293_v36 = vsel %vm255_vm11, %v292_v27, %v291_v29 }
  0xcb   :  { %v139_v18 = vpop.xlane.xlu1 %138  ;;  %v171_v31 = vpop.xlane.xlu2 %170 }
  0xcc   :  { %v169_v25 = vpop.xlane.xlu0 %168  ;;  %v296_v37 = vperm.slane %v171_v31, %v261_v21  ;;  %v262_v38 = vperm.slane %v139_v18, %v261_v21 }
  0xcd   :  { %v294_v30 = vperm.slane %v169_v25, %v257_v16 }
  0xce   :  { %v264_v45 = vsel %vm263_vm13, %v262_v38, %v260_v6 }
  0xcf   :  { %v295_v39 = vsel %vm259_vm12, %v294_v30, %v293_v36 }
  0xd0   :  { %v297_v24 = vsel %vm263_vm13, %v296_v37, %v295_v39 }
  0xd3   :  { %v173_v41 = vpop.xlane.xlu1 %172 }
  0xd4   :  { %v298_v42 = vperm.slane %v173_v41, %v265_v34  ;;  %v141_v43 = vpop.xlane.xlu0 %140 }
  0xd5   :  { %v266_v44 = vperm.slane %v141_v43, %v265_v34 }
  0xd6   :  { %v299_v46 = vsel %vm267_vm14, %v298_v42, %v297_v24 }
  0xd7   :  { %v268_v47 = vsel %vm267_vm14, %v266_v44, %v264_v45 }
  0xd8   :  { %v301_v48 = vsel %vm300_vm15, %v299_v46, %v268_v47 }
  0xd9   :  { %303 = vst [vmem:[#allocation7] sm:$0x3] %v301_v48 }
  0xda   :  { %314 = dma.vmem_to_hbm [thread:$0]  %s310_s1, 32, %s312_s23, [#allocation4]  }
  0xdb   :  { %404 = dma.done.wait [#allocation4], 32  }
  0xdc   :  { %405 = vsyncadd [#allocation4], 4294967264 }
  0xdd   :  { %319 = vsyncpa [#allocation3], 1 }
  0xde   :  { %320 = vsyncpa [#allocation6], 1 }
  0xdf   :  { %321 = vsyncpa [#allocation4], 1 }

</bundles_post_ra>
